<compile_context>
chip_gen: v7x
topology: tpu7x:2x2x1
jax: 0.10.0
libtpu: 0.0.40
codegen_flags: <defaults>
</compile_context>

<pallas_src>
import functools

import jax
import jax.numpy as jnp
from jax import lax
from jax.experimental import pallas as pl
from jax.experimental.pallas import tpu as pltpu


# ----------------------------- kernels ---------------------------------- #

def _lws_linear_kernel(x_ref, w_ref, b_ref, s_ref, o_ref, acc_ref, *,
                       mxu_dtype):
    """out = (x @ W + b) * learned_norm, scale applied in the epilogue."""
    k = pl.program_id(2)

    @pl.when(k == 0)
    def _():
        acc_ref[...] = jnp.zeros_like(acc_ref)

    acc_ref[...] += jnp.dot(x_ref[...].astype(mxu_dtype),
                            w_ref[...].astype(mxu_dtype),
                            preferred_element_type=jnp.float32)

    @pl.when(k == pl.num_programs(2) - 1)
    def _():
        o_ref[...] = ((acc_ref[...] + b_ref[...].astype(jnp.float32))
                      * s_ref[...].astype(jnp.float32)).astype(o_ref.dtype)


def _lws_normed_kernel(x_ref, w_ref, s_ref, o_ref, acc_ref, ssq_ref, *,
                       mxu_dtype):
    """out = (x @ W) * rsqrt(row_ssq(x)) * col_scale
       col_scale = learned_norm / max(||W_col||, eps) precomputed per weight
       update.  row_ssq is computed once per (i) tile (at j == 0) and reused
       for every C tile — the j grid axis is "arbitrary" so the scratch is
       guaranteed to persist across j on the same core."""
    j = pl.program_id(1)
    k = pl.program_id(2)

    @pl.when(k == 0)
    def _():
        acc_ref[...] = jnp.zeros_like(acc_ref)

    @pl.when((j == 0) & (k == 0))
    def _():
        ssq_ref[...] = jnp.zeros_like(ssq_ref)

    x = x_ref[...]
    acc_ref[...] += jnp.dot(x.astype(mxu_dtype), w_ref[...].astype(mxu_dtype),
                            preferred_element_type=jnp.float32)

    @pl.when(j == 0)
    def _():
        xf = x.astype(jnp.float32)
        ssq_ref[...] += jnp.sum(xf * xf, axis=1, keepdims=True)

    @pl.when(k == pl.num_programs(2) - 1)
    def _():
        eps = 1e-12
        # 1 / max(||x_row||, eps) == rsqrt(max(row_ssq, eps^2))  (EUP slot)
        inv_x = lax.rsqrt(jnp.maximum(ssq_ref[...], eps * eps))
        o_ref[...] = (acc_ref[...] * inv_x * s_ref[...].astype(jnp.float32)
                      ).astype(o_ref.dtype)


# --------------------------- tiling helpers ------------------------------ #

def _round_up(x, m):
    return (x + m - 1) // m * m


def _pick_tile(d, cap, gran):
    """Largest multiple of `gran` (<= cap) that minimizes the padded extent
    of dimension `d` (padding only to the hardware minimum first)."""
    d_min = _round_up(d, gran)
    best_t, best_pad = gran, _round_up(d_min, gran)
    t = gran
    while t <= min(cap, d_min):
        padded = _round_up(d_min, t)
        if padded < best_pad or (padded == best_pad and t > best_t):
            best_t, best_pad = t, padded
        t += gran
    return best_t, best_pad


def _plan_batch(batch, n_parallel_other, tm_cap=256):
    tm, Bp = _pick_tile(batch, tm_cap, 8)
    # v7x megacore occupancy: if the parallel part of the grid would be a
    # single tile, halve tm (when possible) so both TensorCores get work.
    if (Bp // tm) * n_parallel_other == 1 and tm % 16 == 0:
        tm //= 2
    return tm, Bp


def _pad2(a, rows, cols):
    r, c = a.shape
    if r == rows and c == cols:
        return a
    return jnp.pad(a, ((0, rows - r), (0, cols - c)))


# Tile caps sized so double-buffered x/w/out tiles + f32 accumulator stay
# within ~13 MiB worst case (f32): safe on v5e/v6e/v7x with the explicit
# 32 MiB scoped-VMEM limit below.
_TM_CAP, _TN_CAP, _TK_CAP = 256, 1024, 1024
_VMEM_LIMIT = 32 * 1024 * 1024


# --------------------------- shared driver ------------------------------- #

def _tiled_forward(kernel, xp, wp, col_vecs, tm, tn, tk, out_dtype, *,
                   extra_row_scratch, dim_sem):
    Bp, Fp = xp.shape
    Fp2, Cp = wp.shape
    assert Fp == Fp2
    grid = (Bp // tm, Cp // tn, Fp // tk)

    scratch = [pltpu.VMEM((tm, tn), jnp.float32)]
    if extra_row_scratch:
        scratch.append(pltpu.VMEM((tm, 1), jnp.float32))
    vec_specs = [pl.BlockSpec((1, tn), lambda i, j, k: (0, j))
                 for _ in col_vecs]

    return pl.pallas_call(
        kernel,
        out_shape=jax.ShapeDtypeStruct((Bp, Cp), out_dtype),
        grid_spec=pltpu.PrefetchScalarGridSpec(
            num_scalar_prefetch=0,
            grid=grid,
            in_specs=[pl.BlockSpec((tm, tk), lambda i, j, k: (i, k)),
                      pl.BlockSpec((tk, tn), lambda i, j, k: (k, j)),
                      *vec_specs],
            out_specs=pl.BlockSpec((tm, tn), lambda i, j, k: (i, j)),
            scratch_shapes=scratch),
        compiler_params=pltpu.CompilerParams(
            dimension_semantics=dim_sem,
            vmem_limit_bytes=_VMEM_LIMIT),
    )(xp, wp, *col_vecs)


# ---------------------- static (per-weight) prep -------------------------- #

def prepare_linear_params(w, b, learned_norm):
    """use_norm=False.  w:(F,C)=W^T, b:(C,) or (1,C), learned_norm:(1,C).
    Done once per weight update (not per forward): pick F/C tiles and pad."""
    F, C = w.shape
    tk, Fp = _pick_tile(F, _TK_CAP, 128)
    tn, Cp = _pick_tile(C, _TN_CAP, 128)
    return dict(
        w=_pad2(w, Fp, Cp),
        b=_pad2(jnp.reshape(b, (1, -1)), 1, Cp),
        s=_pad2(jnp.reshape(learned_norm, (1, -1)), 1, Cp),
        F=F, C=C, Fp=Fp, Cp=Cp, tk=tk, tn=tn,
    )


def prepare_normed_params(w, learned_norm):
    """use_norm=True.  w:(F,C), learned_norm:(1,C).  Column norms of W are
    batch-independent: fold 1/||W_col|| and learned_norm into one per-column
    scale here, once per weight update."""
    F, C = w.shape
    tk, Fp = _pick_tile(F, _TK_CAP, 128)
    tn, Cp = _pick_tile(C, _TN_CAP, 128)
    eps = 1e-12
    w32 = w.astype(jnp.float32)
    inv_w_norm = lax.rsqrt(jnp.maximum(
        jnp.sum(w32 * w32, axis=0, keepdims=True), eps * eps))
    col_scale = inv_w_norm * jnp.reshape(learned_norm, (1, -1)).astype(jnp.float32)
    return dict(
        w=_pad2(w, Fp, Cp),
        s=_pad2(col_scale, 1, Cp),
        F=F, C=C, Fp=Fp, Cp=Cp, tk=tk, tn=tn,
    )


# ------------------------------ forwards ---------------------------------- #

def lws_linear(x, params, mxu_dtype=None):
    """use_norm=False path.  x:(B,F).  Set mxu_dtype=jnp.bfloat16 on v6e/v7x
    to feed the bf16-native MXU (f32 accumulate + f32 epilogue kept)."""
    B, F = x.shape
    assert F == params["F"]
    tm, Bp = _plan_batch(B, params["Cp"] // params["tn"], _TM_CAP)
    xp = _pad2(x, Bp, params["Fp"])
    kern = functools.partial(_lws_linear_kernel,
                             mxu_dtype=mxu_dtype or x.dtype)
    out = _tiled_forward(kern, xp, params["w"], [params["b"], params["s"]],
                         tm, params["tn"], params["tk"], x.dtype,
                         extra_row_scratch=False,
                         dim_sem=("parallel", "parallel", "arbitrary"))
    return out[:B, :params["C"]]


def lws_normed(x, params, mxu_dtype=None):
    """use_norm=True path.  x:(B,F)."""
    B, F = x.shape
    assert F == params["F"]
    # Only the batch axis is "parallel" here (j must stay sequential per core
    # for the row-ssq reuse), so occupancy is driven by the i tiling alone.
    tm, Bp = _plan_batch(B, 1, _TM_CAP)
    xp = _pad2(x, Bp, params["Fp"])
    kern = functools.partial(_lws_normed_kernel,
                             mxu_dtype=mxu_dtype or x.dtype)
    out = _tiled_forward(kern, xp, params["w"], [params["s"]],
                         tm, params["tn"], params["tk"], x.dtype,
                         extra_row_scratch=True,
                         dim_sem=("parallel", "arbitrary", "arbitrary"))
    return out[:B, :params["C"]]


# ----------------------------- references --------------------------------- #

def ref_linear(x, w, b, learned_norm):
    y = jnp.dot(x, w, precision=lax.Precision.HIGHEST)
    return (y + b) * learned_norm


def ref_normed(x, w, learned_norm):
    eps = 1e-12
    xn = x / jnp.maximum(jnp.linalg.norm(x, axis=1, keepdims=True), eps)
    wn = w / jnp.maximum(jnp.linalg.norm(w, axis=0, keepdims=True), eps)
    y = jnp.dot(xn, wn, precision=lax.Precision.HIGHEST)
    return y * learned_norm


# -------------------------------- main ------------------------------------ #

def _run_case(key, batch, feat_dim, num_classes, mxu_dtype, atol, rtol):
    k_x, k_w, k_b, k_wn, k_s = jax.random.split(key, 5)

    x = jax.random.normal(k_x, (batch, feat_dim), dtype=jnp.float32)

    # nn.Linear params stored pre-transposed as (F, C) = W^T
    bound = 1.0 / (feat_dim ** 0.5)
    w_lin = jax.random.uniform(k_w, (feat_dim, num_classes),
                               minval=-bound, maxval=bound, dtype=jnp.float32)
    b_lin = jax.random.uniform(k_b, (num_classes,),
                               minval=-bound, maxval=bound, dtype=jnp.float32)

    # NormedLinear weight: uniform(-1, 1); the forward normalize makes the
    # renorm_/mul_ init scaling irrelevant to the output.
    w_nrm = jax.random.uniform(k_wn, (feat_dim, num_classes),
                               minval=-1.0, maxval=1.0, dtype=jnp.float32)

    # learned_norm initialises to ones; use a non-trivial value so the scaling
    # path is actually exercised.
    learned_norm = 1.0 + 0.1 * jax.random.normal(
        k_s, (1, num_classes), dtype=jnp.float32)

    # --- use_norm=False ---
    lin_params = prepare_linear_params(w_lin, b_lin, learned_norm)  # once
    out_lin = lws_linear(x, lin_params, mxu_dtype=mxu_dtype)
    jax.block_until_ready(out_lin)
    assert jnp.allclose(out_lin,
                        ref_linear(x, w_lin, b_lin.reshape(1, -1), learned_norm),
                        atol=atol, rtol=rtol), "linear path mismatch"

    # --- use_norm=True ---
    nrm_params = prepare_normed_params(w_nrm, learned_norm)         # once
    out_nrm = lws_normed(x, nrm_params, mxu_dtype=mxu_dtype)
    jax.block_until_ready(out_nrm)
    assert jnp.allclose(out_nrm, ref_normed(x, w_nrm, learned_norm),
                        atol=atol, rtol=rtol), "normed path mismatch"


if __name__ == "__main__":
    k0, k1, k2 = jax.random.split(jax.random.PRNGKey(0), 3)

    # Small shapes consistent with the module (single-tile grid after the
    # minimal (8,128) padding).
    _run_case(k0, batch=8, feat_dim=32, num_classes=16,
              mxu_dtype=None, atol=1e-5, rtol=1e-5)

    # Non-aligned shapes exercising the multi-tile (i,j,k)=(2,2,2) grid,
    # the k-accumulator, the j==0 ssq reuse, and minimal padding
    # (300,1536,1200 -> 304,1536,1280).
    _run_case(k1, batch=300, feat_dim=1536, num_classes=1200,
              mxu_dtype=None, atol=2e-4, rtol=2e-4)

    # Same shapes with bf16 MXU inputs (v6e/v7x fast path); f32 accumulation
    # and f32 epilogue keep the error small.
    _run_case(k2, batch=300, feat_dim=1536, num_classes=1200,
              mxu_dtype=jnp.bfloat16, atol=3e-2, rtol=3e-2)

    print("KERNEL_OK")
</pallas_src>

<mosaic_0001>
module attributes {stable_mosaic.version = 11 : i64} {
  func.func @_lws_linear_kernel(%arg0: i32, %arg1: i32, %arg2: i32, %arg3: memref<8x128xf32, #tpu.memory_space<vmem>>, %arg4: memref<128x128xf32, #tpu.memory_space<vmem>>, %arg5: memref<1x128xf32, #tpu.memory_space<vmem>>, %arg6: memref<1x128xf32, #tpu.memory_space<vmem>>, %arg7: memref<8x128xf32, #tpu.memory_space<vmem>>, %arg8: memref<8x128xf32, #tpu.memory_space<vmem>>) attributes {dimension_semantics = [#tpu.dimension_semantics<parallel>, #tpu.dimension_semantics<parallel>, #tpu.dimension_semantics<arbitrary>], iteration_bounds = array<i64: 1, 1, 1>, scalar_prefetch = 0 : i64, scratch_operands = 1 : i64, tpu.core_type = #tpu.core_type<tc>, window_params = [{transform_indices = @transform_0, window_bounds = array<i64: 8, 128>}, {transform_indices = @transform_1, window_bounds = array<i64: 128, 128>}, {transform_indices = @transform_2, window_bounds = array<i64: 1, 128>}, {transform_indices = @transform_3, window_bounds = array<i64: 1, 128>}, {transform_indices = @transform_4, window_bounds = array<i64: 8, 128>}]} {
    %c0_i32 = arith.constant 0 : i32
    %0 = arith.cmpi eq, %arg2, %c0_i32 : i32
    %1 = arith.extui %0 : i1 to i32
    %c0_i32_0 = arith.constant 0 : i32
    %2 = arith.cmpi ne, %1, %c0_i32_0 : i32
    scf.if %2 {
      %cst_10 = arith.constant 0.000000e+00 : f32
      %12 = vector.broadcast %cst_10 : f32 to vector<8x128xf32>
      %c0_11 = arith.constant 0 : index
      %c0_12 = arith.constant 0 : index
      %13 = vector.load %arg8[%c0_11, %c0_12] : memref<8x128xf32, #tpu.memory_space<vmem>>, vector<8x128xf32>
      tpu.vector_store %arg8[%c0_11, %c0_12], %12 {strides = array<i32>} : memref<8x128xf32, #tpu.memory_space<vmem>>, vector<8x128xf32>,
    } else {
    }
    %c0 = arith.constant 0 : index
    %c0_1 = arith.constant 0 : index
    %3 = vector.load %arg8[%c0, %c0_1] : memref<8x128xf32, #tpu.memory_space<vmem>>, vector<8x128xf32>
    %c0_2 = arith.constant 0 : index
    %c0_3 = arith.constant 0 : index
    %4 = vector.load %arg3[%c0_2, %c0_3] : memref<8x128xf32, #tpu.memory_space<vmem>>, vector<8x128xf32>
    %c0_4 = arith.constant 0 : index
    %c0_5 = arith.constant 0 : index
    %5 = vector.load %arg4[%c0_4, %c0_5] : memref<128x128xf32, #tpu.memory_space<vmem>>, vector<128x128xf32>
    %cst = arith.constant dense<0.000000e+00> : vector<8x128xf32>
    %6 = tpu.matmul %4, %5, %cst {dimension_numbers = #tpu.dot_dimension_numbers<[1], [0], [0], [1], [0, 0, 1, 1], [], []>} : vector<8x128xf32>, vector<128x128xf32>, vector<8x128xf32> -> vector<8x128xf32>
    %7 = arith.addf %3, %6 : vector<8x128xf32>
    %c0_6 = arith.constant 0 : index
    %c0_7 = arith.constant 0 : index
    %8 = vector.load %arg8[%c0_6, %c0_7] : memref<8x128xf32, #tpu.memory_space<vmem>>, vector<8x128xf32>
    tpu.vector_store %arg8[%c0_6, %c0_7], %7 {strides = array<i32>} : memref<8x128xf32, #tpu.memory_space<vmem>>, vector<8x128xf32>,
    %c0_i32_8 = arith.constant 0 : i32
    %9 = arith.cmpi eq, %arg2, %c0_i32_8 : i32
    %10 = arith.extui %9 : i1 to i32
    %c0_i32_9 = arith.constant 0 : i32
    %11 = arith.cmpi ne, %10, %c0_i32_9 : i32
    scf.if %11 {
      %c0_10 = arith.constant 0 : index
      %c0_11 = arith.constant 0 : index
      %12 = vector.load %arg8[%c0_10, %c0_11] : memref<8x128xf32, #tpu.memory_space<vmem>>, vector<8x128xf32>
      %c0_12 = arith.constant 0 : index
      %c0_13 = arith.constant 0 : index
      %13 = vector.load %arg5[%c0_12, %c0_13] : memref<1x128xf32, #tpu.memory_space<vmem>>, vector<1x128xf32>
      %14 = vector.broadcast %13 : vector<1x128xf32> to vector<8x128xf32>
      %15 = arith.addf %12, %14 : vector<8x128xf32>
      %c0_14 = arith.constant 0 : index
      %c0_15 = arith.constant 0 : index
      %16 = vector.load %arg6[%c0_14, %c0_15] : memref<1x128xf32, #tpu.memory_space<vmem>>, vector<1x128xf32>
      %17 = vector.broadcast %16 : vector<1x128xf32> to vector<8x128xf32>
      %18 = arith.mulf %15, %17 : vector<8x128xf32>
      %c0_16 = arith.constant 0 : index
      %c0_17 = arith.constant 0 : index
      %19 = vector.load %arg7[%c0_16, %c0_17] : memref<8x128xf32, #tpu.memory_space<vmem>>, vector<8x128xf32>
      tpu.vector_store %arg7[%c0_16, %c0_17], %18 {strides = array<i32>} : memref<8x128xf32, #tpu.memory_space<vmem>>, vector<8x128xf32>,
    } else {
    }
    return
  }
  func.func @transform_0(%arg0: i32, %arg1: i32, %arg2: i32) -> (i32, i32) {
    %c0_i32 = arith.constant 0 : i32
    return %arg0, %arg2 : i32, i32
  }
  func.func @transform_1(%arg0: i32, %arg1: i32, %arg2: i32) -> (i32, i32) {
    %c0_i32 = arith.constant 0 : i32
    return %arg2, %arg1 : i32, i32
  }
  func.func @transform_2(%arg0: i32, %arg1: i32, %arg2: i32) -> (i32, i32) {
    %c0_i32 = arith.constant 0 : i32
    %c0_i32_0 = arith.constant 0 : i32
    return %c0_i32, %arg1 : i32, i32
  }
  func.func @transform_3(%arg0: i32, %arg1: i32, %arg2: i32) -> (i32, i32) {
    %c0_i32 = arith.constant 0 : i32
    %c0_i32_0 = arith.constant 0 : i32
    return %c0_i32, %arg1 : i32, i32
  }
  func.func @transform_4(%arg0: i32, %arg1: i32, %arg2: i32) -> (i32, i32) {
    %c0_i32 = arith.constant 0 : i32
    return %arg0, %arg1 : i32, i32
  }
}

</mosaic_0001>

<bundles_post_ra>
// kernel: tpu_custom_call.1
= control target key start
LH: loop header
LB: loop body
LE: loop exit
PB: predicated region body
PF: predicated region fallthrough
CT: control target
= control target key end

     0   :  { %9 = vsyncpa [#allocation4], 0  ;;  %s416_s0 = inlined_call_operand.hbm [shape: f32[8,128], index: 0, kind: input, shape index: {}]   ;;  %s417_s1 = inlined_call_operand.hbm [shape: f32[128,128], index: 1, kind: input, shape index: {}]   ;;  %s418_s2 = inlined_call_operand.vmem [shape: f32[1,128], index: 2, kind: input, shape index: {}]   ;;  %s419_s3 = inlined_call_operand.vmem [shape: f32[1,128], index: 3, kind: input, shape index: {}]   ;;  %s420_s4 = inlined_call_operand.hbm [shape: f32[8,128], index: 4, kind: output, shape index: {}]  }
   0x1   :  { %10 = vsyncpa [#allocation7], 0 }
   0x2   :  { %11 = vsyncpa [#allocation5], 0  ;;  %s334_s15 = smov [#allocation3]   ;;  %s335_s17 = smov [#allocation6]  }
   0x3   :  { %s18_s16 = sshll.u32 %s334_s15, 4  ;;  %s27_s18 = sshll.u32 %s335_s17, 4  ;;  %s19_s16 = int_to_ptr.vmem [resolvable:$true] %s18_s16  ;;  %s367_s18 = int_to_ptr.vmem [resolvable:$true] %s27_s18 }
   0x4   :  { %s262_s21 = scalar_lea.hbm %s416_s0, 128 }
   0x5   :  { %p263_p0 = scmp.ne.s32.totalorder %s416_s0, %s262_s21  ;;  %p266_p1 = scmp.lt.u32.totalorder %s262_s21, %s416_s0 }
   0x7   :  { %p268_p2 = pnand %p266_p1, %p263_p0 }
   0x9   :  { %271 = shalt.err (!%p268_p2)
}
   0xa   :  { %s272_s26 = scalar_lea.vmem %s19_s16, 128  ;;  %p277_p4 = scmp.lt.s32.totalorder %s19_s16, %s19_s16 }
   0xb   :  { %p273_p3 = scmp.ne.s32.totalorder %s19_s16, %s272_s26  ;;  %p278_p5 = scmp.lt.s32.totalorder %s272_s26, %s272_s26 }
   0xd   :  { %p279_p6 = por %p278_p5, %p277_p4 }
   0xf   :  { %p280_p7 = pnand %p279_p6, %p273_p3 }
  0x11   :  { %283 = shalt.err (!%p280_p7)
}
  0x12   :  { %21 = dma.hbm_to_vmem [thread:$0]  %s416_s0, 128, %s19_s16, [#allocation4]  }
  0x13   :  { %s284_s5 = scalar_lea.hbm %s417_s1, 2048 }
  0x14   :  { %p285_p8 = scmp.ne.s32.totalorder %s417_s1, %s284_s5  ;;  %p288_p9 = scmp.lt.u32.totalorder %s284_s5, %s417_s1 }
  0x16   :  { %p290_p10 = pnand %p288_p9, %p285_p8 }
  0x18   :  { %293 = shalt.err (!%p290_p10)
}
  0x19   :  { %s294_s10 = scalar_lea.vmem %s367_s18, 2048  ;;  %p299_p12 = scmp.lt.s32.totalorder %s367_s18, %s367_s18 }
  0x1a   :  { %p295_p11 = scmp.ne.s32.totalorder %s367_s18, %s294_s10  ;;  %p300_p13 = scmp.lt.s32.totalorder %s294_s10, %s294_s10 }
  0x1c   :  { %p301_p0 = por %p300_p13, %p299_p12 }
  0x1e   :  { %p302_p1 = pnand %p301_p0, %p295_p11 }
  0x20   :  { %305 = shalt.err (!%p302_p1)
}
  0x21   :  { %s336_s0 = smov 128   ;;  %s337_s11 = smov 8  }
  0x22   :  { %33 = dma.hbm_to_vmem [thread:$0]  %s417_s1, 2048, %s367_s18, [#allocation7], %s336_s0, %s336_s0, %s337_s11  }
  0x23   :  { %328 = dma.done.wait [#allocation4], 128  }
  0x24   :  { %329 = vsyncadd [#allocation4], 4294967168 }
  0x25   :  { %330 = dma.done.wait [#allocation7], 2048  }
  0x26   :  { %331 = vsyncadd [#allocation7], 4294965248  ;;  %v338_v0 = vmov 0.0|0.0   ;;  %vm339_vm0 = vmmov 0   ;;  %v340_v1 = vmov 0.0   ;;  %v51_v2 = vld [vmem:[#allocation6] sm:$0xff] }
  0x27   :  { %230 = vmatprep.subr.bf16.mxu0 %v338_v0  ;;  %227 = vmatprep.mubr.msk.f32.mxu0 %vm339_vm0, %v340_v1  ;;  %v52_v3 = vld [vmem:[#allocation6 + $0x8] sm:$0xff]  ;;  %v53_v4 = vld [vmem:[#allocation6 + $0x10] sm:$0xff]  ;;  %v54_v6 = vld [vmem:[#allocation6 + $0x18] sm:$0xff]  ;;  %s341_s17 = smov [#allocation8]  }
  0x28   :  { %v231_v5 = vpack.c.bf16 %v52_v3, %v51_v2  ;;  %v234_v7 = vpack.c.bf16 %v54_v6, %v53_v4  ;;  %v55_v8 = vld [vmem:[#allocation6 + $0x20] sm:$0xff]  ;;  %v56_v9 = vld [vmem:[#allocation6 + $0x28] sm:$0xff]  ;;  %v57_v11 = vld [vmem:[#allocation6 + $0x30] sm:$0xff]  ;;  %s166_s18 = sshll.u32 %s341_s17, 4  ;;  %s167_s18 = int_to_ptr.vmem [resolvable:$true] %s166_s18 }
  0x29   :  { %v237_v10 = vpack.c.bf16 %v56_v9, %v55_v8  ;;  %v58_v12 = vld [vmem:[#allocation6 + $0x38] sm:$0xff]  ;;  %v59_v14 = vld [vmem:[#allocation6 + $0x40] sm:$0xff]  ;;  %v60_v15 = vld [vmem:[#allocation6 + $0x48] sm:$0xff]  ;;  %s306_s19 = scalar_lea.vmem %s167_s18, 128  ;;  %p311_p3 = scmp.lt.s32.totalorder %s167_s18, %s167_s18 }
  0x2a   :  { %232 = vmatpush3.bf16.msra.mxu0 %v231_v5  ;;  %v240_v13 = vpack.c.bf16 %v58_v12, %v57_v11  ;;  %v243_v16 = vpack.c.bf16 %v60_v15, %v59_v14  ;;  %v61_v17 = vld [vmem:[#allocation6 + $0x50] sm:$0xff]  ;;  %v62_v18 = vld [vmem:[#allocation6 + $0x58] sm:$0xff]  ;;  %v63_v20 = vld [vmem:[#allocation6 + $0x60] sm:$0xff]  ;;  %p307_p2 = scmp.ne.s32.totalorder %s167_s18, %s306_s19  ;;  %p312_p4 = scmp.lt.s32.totalorder %s306_s19, %s306_s19 }
  0x2b   :  { %233 = vmatprep.subr.bf16.mxu0 %v338_v0  ;;  %v246_v19 = vpack.c.bf16 %v62_v18, %v61_v17  ;;  %v64_v21 = vld [vmem:[#allocation6 + $0x68] sm:$0xff]  ;;  %v65_v23 = vld [vmem:[#allocation6 + $0x70] sm:$0xff]  ;;  %v66_v24 = vld [vmem:[#allocation6 + $0x78] sm:$0xff] }
  0x2c   :  { %v249_v22 = vpack.c.bf16 %v64_v21, %v63_v20  ;;  %v252_v25 = vpack.c.bf16 %v66_v24, %v65_v23  ;;  %v50_v26 = vld [vmem:[#allocation3] sm:$0xff]  ;;  %p313_p5 = por %p312_p4, %p311_p3 }
  0x2d   :  { %v176_v27 = vld [vmem:[%s418_s2] ss:$0 sm:$0xff] }
  0x2e   :  { %235 = vmatpush3.bf16.msra.mxu0 %v234_v7  ;;  %v177_v29 = vld [vmem:[%s419_s3] ss:$0 sm:$0xff]  ;;  %p314_p6 = pnand %p313_p5, %p307_p2 }
  0x2f   :  { %236 = vmatprep.subr.bf16.mxu0 %v338_v0 }
  0x32   :  { %238 = vmatpush3.bf16.msra.mxu0 %v237_v10 }
  0x33   :  { %239 = vmatprep.subr.bf16.mxu0 %v338_v0 }
  0x36   :  { %241 = vmatpush3.bf16.msra.mxu0 %v240_v13 }
  0x37   :  { %242 = vmatprep.subr.bf16.mxu0 %v338_v0 }
  0x3a   :  { %244 = vmatpush3.bf16.msra.mxu0 %v243_v16 }
  0x3b   :  { %245 = vmatprep.subr.bf16.mxu0 %v338_v0 }
  0x3e   :  { %247 = vmatpush3.bf16.msra.mxu0 %v246_v19 }
  0x3f   :  { %248 = vmatprep.subr.bf16.mxu0 %v338_v0 }
  0x42   :  { %250 = vmatpush3.bf16.msra.mxu0 %v249_v22 }
  0x43   :  { %251 = vmatprep.subr.bf16.mxu0 %v338_v0 }
  0x46   :  { %253 = vmatpush3.bf16.msra.mxu0 %v252_v25 }
  0x49   :  { %228 = vmatmul.mubr.f32.vlgmr.msra.gmra.mrb[0].mxu0 %v50_v26 }
 0x11c   :  { %v133_v28 = vpop.f32.mrb[0].mxu0 }
 0x11d   :  { %v150_v30 = vadd.f32 %v176_v27, %v133_v28  ;;  %v229_v31 = vpop.f32.mrb[1].mxu0 }
 0x11f   :  { %v158_v32 = vmul.f32 %v177_v29, %v150_v30 }
 0x121   :  { %159 = vst [vmem:[#allocation8] sm:$0xff] %v158_v32 }
 0x122   :  { %317 = shalt.err (!%p314_p6)
}
 0x123   :  { %s318_s21 = scalar_lea.hbm %s420_s4, 128 }
 0x124   :  { %p319_p7 = scmp.ne.s32.totalorder %s420_s4, %s318_s21  ;;  %p322_p8 = scmp.lt.u32.totalorder %s318_s21, %s420_s4 }
 0x126   :  { %p324_p9 = pnand %p322_p8, %p319_p7 }
 0x128   :  { %327 = shalt.err (!%p324_p9)
}
 0x129   :  { %169 = dma.vmem_to_hbm [thread:$0]  %s167_s18, 128, %s420_s4, [#allocation5]  }
 0x12a   :  { %332 = dma.done.wait [#allocation5], 128  }
 0x12b   :  { %333 = vsyncadd [#allocation5], 4294967168 }
 0x12c   :  { %173 = vsyncpa [#allocation4], 1 }
 0x12d   :  { %174 = vsyncpa [#allocation7], 1 }
 0x12e   :  { %175 = vsyncpa [#allocation5], 1 }

</bundles_post_ra>
